<compile_context>
chip_gen: v7x
topology: tpu7x:2x2x1
jax: 0.10.0
libtpu: 0.0.40
codegen_flags: <defaults>
</compile_context>

<pallas_src>
import functools

import jax
import jax.numpy as jnp
import numpy as np
from jax.experimental import pallas as pl
from jax.experimental.pallas import tpu as pltpu


def _gelu_exact(x):
    # matches torch.nn.GELU() default (erf-based, not tanh approximation)
    return 0.5 * x * (1.0 + jax.lax.erf(x / jnp.sqrt(jnp.float32(2.0))))


def basic_block_kernel(xcol_ref, xres_ref, mask_ref, w1_ref, w2_ref, bn_ref,
                       o_ref, *, width):
    # xcol_ref : (nb, 9*Cin, HW) bf16   im2col'd input (tap-major rows)
    # xres_ref : (nb, Cin,  HW) f32     unpadded input for the residual path
    # mask_ref : (9, 1, HW)     f32     {0,1} conv2 boundary masks per tap
    # w1_ref   : (Cp, 9*Cin)    bf16    conv1 weights (fused-tap matrix)
    # w2_ref   : (9, Cp, Cp)    bf16    conv2 weights, tap-major
    # bn_ref   : (Cp, 4)        f32     columns: [s1, b1, s2, b2] folded BN
    # o_ref    : (nb, Cp, HW)   f32
    nb = xcol_ref.shape[0]
    hw = xcol_ref.shape[2]

    # Folded BatchNorm affine params as (Cp, 1) columns (broadcast over lanes).
    s1 = bn_ref[:, 0:1]
    b1 = bn_ref[:, 1:2]
    s2 = bn_ref[:, 2:3]
    b2 = bn_ref[:, 3:4]

    w1 = w1_ref[...]                     # (Cp, 9*Cin) bf16, hoisted

    for n in range(nb):                  # static unroll over batch block
        xc = xcol_ref[n]                 # (9*Cin, HW) bf16

        # ---- conv1: single fused 9-tap MXU matmul, f32 accumulation ----
        acc1 = jnp.dot(w1, xc, preferred_element_type=jnp.float32)  # (Cp, HW)

        # ---- bn1 + gelu (f32) ----
        out1 = _gelu_exact(acc1 * s1 + b1)                          # (Cp, HW)

        # ---- conv2: 9 lane-rolled, masked matmuls, register accumulation ----
        acc2 = None
        for k in range(9):
            dh, dw = k // 3, k % 3
            off = (dh - 1) * width + (dw - 1)   # static per-tap spatial offset
            if off == 0:
                shifted = out1               # center tap: no shift, all-valid
            else:
                rolled = pltpu.roll(out1, (-off) % hw, axis=1)      # XLU lane roll
                shifted = rolled * mask_ref[k]                      # zero halo
            contrib = jnp.dot(w2_ref[k], shifted.astype(jnp.bfloat16),
                              preferred_element_type=jnp.float32)
            acc2 = contrib if acc2 is None else acc2 + contrib

        # ---- bn2 + residual add + gelu (f32) ----
        out2 = acc2 * s2 + b2 + xres_ref[n]
        o_ref[n] = _gelu_exact(out2).astype(o_ref.dtype)


def basic_block_forward(x_nchw, w1, w2, bn1, bn2, *, batch_block=1):
    """x_nchw: (N, C, H, W) float32 (PyTorch layout).  downsample=None, stride=1."""
    N, Cin, H, W = x_nchw.shape
    Cp = w1.shape[0]
    assert Cin == Cp, "downsample=None requires inplanes == planes"
    assert N % batch_block == 0
    HW = H * W

    x = x_nchw.astype(jnp.float32)

    # ---- im2col for conv1 (wrapper-side, XLA): (N, 9*Cin, HW), tap-major rows ----
    xp = jnp.pad(x, ((0, 0), (0, 0), (1, 1), (1, 1)))
    taps = [xp[:, :, dh:dh + H, dw:dw + W].reshape(N, Cin, HW)
            for dh in range(3) for dw in range(3)]
    xcol = jnp.concatenate(taps, axis=1).astype(jnp.bfloat16)     # (N, 9*Cin, HW)

    # Residual path: unpadded input, channels-in-sublanes layout (no transpose).
    xres = x.reshape(N, Cin, HW)                                   # f32

    # conv weights: torch (Cout, Cin, 3, 3)
    #   conv1 fused: (Cp, 9*Cin) with columns ordered (tap-major, then Cin)
    w1c = jnp.transpose(w1, (0, 2, 3, 1)).reshape(Cp, 9 * Cin).astype(jnp.bfloat16)
    #   conv2 per tap: (9, Cout, Cin)
    w2r = jnp.transpose(w2, (2, 3, 0, 1)).reshape(9, Cp, Cp).astype(jnp.bfloat16)

    # Folded eval-mode BatchNorm -> per-channel scale/bias, packed as (Cp, 4).
    eps = 1e-5
    g1, be1, m1, v1 = bn1
    g2, be2, m2, v2 = bn2
    s1 = g1 / jnp.sqrt(v1 + eps)
    o1 = be1 - m1 * s1
    s2 = g2 / jnp.sqrt(v2 + eps)
    o2 = be2 - m2 * s2
    bn = jnp.stack([s1, o1, s2, o2], axis=1).astype(jnp.float32)   # (Cp, 4)

    # conv2 boundary masks: compile-time {0,1} constants, one (1, HW) row per tap.
    hh, ww = np.meshgrid(np.arange(H), np.arange(W), indexing="ij")
    mask_np = np.zeros((9, 1, HW), np.float32)
    for k in range(9):
        dh, dw = k // 3, k % 3
        valid = ((hh + dh - 1 >= 0) & (hh + dh - 1 < H) &
                 (ww + dw - 1 >= 0) & (ww + dw - 1 < W))
        mask_np[k, 0] = valid.reshape(-1).astype(np.float32)
    masks = jnp.asarray(mask_np)

    nb = batch_block
    kernel = functools.partial(basic_block_kernel, width=W)

    out = pl.pallas_call(
        kernel,
        out_shape=jax.ShapeDtypeStruct((N, Cp, HW), jnp.float32),
        grid_spec=pltpu.PrefetchScalarGridSpec(
            num_scalar_prefetch=0,
            grid=(N // nb,),
            in_specs=[
                pl.BlockSpec((nb, 9 * Cin, HW), lambda i: (i, 0, 0)),
                pl.BlockSpec((nb, Cin, HW), lambda i: (i, 0, 0)),
                pl.BlockSpec((9, 1, HW), lambda i: (0, 0, 0)),
                pl.BlockSpec((Cp, 9 * Cin), lambda i: (0, 0)),
                pl.BlockSpec((9, Cp, Cp), lambda i: (0, 0, 0)),
                pl.BlockSpec((Cp, 4), lambda i: (0, 0)),
            ],
            out_specs=pl.BlockSpec((nb, Cp, HW), lambda i: (i, 0, 0)),
        ),
        compiler_params=pltpu.CompilerParams(
            dimension_semantics=("parallel",)),   # batch elems independent (v7x 2 TCs)
    )(xcol, xres, masks, w1c, w2r, bn)

    return out.reshape(N, Cp, H, W)               # already NCHW — no transpose


def reference_forward(x_nchw, w1, w2, bn1, bn2):
    """Pure-JAX reference (eval-mode BatchNorm), mirrors the PyTorch forward."""
    eps = 1e-5

    def conv(x, w):
        return jax.lax.conv_general_dilated(
            x, w, window_strides=(1, 1), padding=((1, 1), (1, 1)),
            dimension_numbers=("NCHW", "OIHW", "NCHW"))

    def bn(x, p):
        g, b, m, v = p
        return ((x - m[None, :, None, None])
                / jnp.sqrt(v[None, :, None, None] + eps)
                * g[None, :, None, None] + b[None, :, None, None])

    gelu = lambda t: 0.5 * t * (1.0 + jax.lax.erf(t / jnp.sqrt(jnp.float32(2.0))))

    out = gelu(bn(conv(x_nchw, w1), bn1))
    out = bn(conv(out, w2), bn2)
    out = out + x_nchw          # downsample is None -> identity
    return gelu(out)


if __name__ == "__main__":
    # BasicBlock(inplanes=4, planes=4, stride=1, downsample=None)
    N, C, H, W = 2, 4, 16, 16
    key = jax.random.PRNGKey(0)
    k = jax.random.split(key, 12)

    x = jax.random.normal(k[0], (N, C, H, W), jnp.float32)

    # conv weights: (Cout, Cin, 3, 3), no bias (matches conv3x3)
    w1 = 0.1 * jax.random.normal(k[1], (C, C, 3, 3), jnp.float32)
    w2 = 0.1 * jax.random.normal(k[2], (C, C, 3, 3), jnp.float32)

    # BatchNorm2d params (eval mode, deterministic synthetic stats)
    bn1 = (1.0 + 0.1 * jax.random.normal(k[3], (C,), jnp.float32),   # gamma
           0.1 * jax.random.normal(k[4], (C,), jnp.float32),         # beta
           0.1 * jax.random.normal(k[5], (C,), jnp.float32),         # running_mean
           1.0 + 0.1 * jax.random.uniform(k[6], (C,), jnp.float32))  # running_var
    bn2 = (1.0 + 0.1 * jax.random.normal(k[7], (C,), jnp.float32),
           0.1 * jax.random.normal(k[8], (C,), jnp.float32),
           0.1 * jax.random.normal(k[9], (C,), jnp.float32),
           1.0 + 0.1 * jax.random.uniform(k[10], (C,), jnp.float32))

    out = basic_block_forward(x, w1, w2, bn1, bn2, batch_block=1)
    out = jax.block_until_ready(out)

    ref = jax.block_until_ready(reference_forward(x, w1, w2, bn1, bn2))
    # bf16 MXU operands -> relaxed tolerance vs the f32 reference
    np.testing.assert_allclose(np.asarray(out), np.asarray(ref),
                               rtol=1e-2, atol=1e-2)

    print("KERNEL_OK")
</pallas_src>

<mosaic_0001>
module attributes {stable_mosaic.version = 11 : i64} {
  func.func @basic_block_kernel(%arg0: i32, %arg1: memref<1x36x256xbf16, #tpu.memory_space<vmem>>, %arg2: memref<1x4x256xf32, #tpu.memory_space<vmem>>, %arg3: memref<9x1x256xf32, #tpu.memory_space<vmem>>, %arg4: memref<4x36xbf16, #tpu.memory_space<vmem>>, %arg5: memref<9x4x4xbf16, #tpu.memory_space<vmem>>, %arg6: memref<4x4xf32, #tpu.memory_space<vmem>>, %arg7: memref<1x4x256xf32, #tpu.memory_space<vmem>>) attributes {dimension_semantics = [#tpu.dimension_semantics<parallel>], iteration_bounds = array<i64: 2>, scalar_prefetch = 0 : i64, scratch_operands = 0 : i64, tpu.core_type = #tpu.core_type<tc>, window_params = [{transform_indices = @transform_0, window_bounds = array<i64: 1, 36, 256>}, {transform_indices = @transform_1, window_bounds = array<i64: 1, 4, 256>}, {pipeline_mode = #tpu.pipeline_mode<synchronous>, transform_indices = @transform_2, window_bounds = array<i64: 9, 1, 256>}, {pipeline_mode = #tpu.pipeline_mode<synchronous>, transform_indices = @transform_3, window_bounds = array<i64: 4, 36>}, {pipeline_mode = #tpu.pipeline_mode<synchronous>, transform_indices = @transform_4, window_bounds = array<i64: 9, 4, 4>}, {pipeline_mode = #tpu.pipeline_mode<synchronous>, transform_indices = @transform_5, window_bounds = array<i64: 4, 4>}, {transform_indices = @transform_6, window_bounds = array<i64: 1, 4, 256>}]} {
    %c0 = arith.constant 0 : index
    %c0_0 = arith.constant 0 : index
    %0 = vector.load %arg6[%c0, %c0_0] : memref<4x4xf32, #tpu.memory_space<vmem>>, vector<4x1xf32>
    %c0_1 = arith.constant 0 : index
    %c1 = arith.constant 1 : index
    %1 = vector.load %arg6[%c0_1, %c1] : memref<4x4xf32, #tpu.memory_space<vmem>>, vector<4x1xf32>
    %c0_2 = arith.constant 0 : index
    %c2 = arith.constant 2 : index
    %2 = vector.load %arg6[%c0_2, %c2] : memref<4x4xf32, #tpu.memory_space<vmem>>, vector<4x1xf32>
    %c0_3 = arith.constant 0 : index
    %c3 = arith.constant 3 : index
    %3 = vector.load %arg6[%c0_3, %c3] : memref<4x4xf32, #tpu.memory_space<vmem>>, vector<4x1xf32>
    %c0_4 = arith.constant 0 : index
    %c0_5 = arith.constant 0 : index
    %4 = vector.load %arg4[%c0_4, %c0_5] : memref<4x36xbf16, #tpu.memory_space<vmem>>, vector<4x36xbf16>
    %c0_6 = arith.constant 0 : index
    %c0_7 = arith.constant 0 : index
    %c0_8 = arith.constant 0 : index
    %5 = vector.load %arg1[%c0_6, %c0_7, %c0_8] : memref<1x36x256xbf16, #tpu.memory_space<vmem>>, vector<1x36x256xbf16>
    %6 = vector.shape_cast %5 : vector<1x36x256xbf16> to vector<36x256xbf16>
    %cst = arith.constant dense<0.000000e+00> : vector<4x256xf32>
    %7 = tpu.matmul %4, %6, %cst {dimension_numbers = #tpu.dot_dimension_numbers<[1], [0], [0], [1], [0, 0, 1, 1], [], []>} : vector<4x36xbf16>, vector<36x256xbf16>, vector<4x256xf32> -> vector<4x256xf32>
    %8 = vector.broadcast %0 : vector<4x1xf32> to vector<4x256xf32>
    %9 = arith.mulf %7, %8 : vector<4x256xf32>
    %10 = vector.broadcast %1 : vector<4x1xf32> to vector<4x256xf32>
    %11 = arith.addf %9, %10 : vector<4x256xf32>
    %cst_9 = arith.constant 5.000000e-01 : f32
    %12 = vector.broadcast %cst_9 : f32 to vector<4x256xf32>
    %13 = arith.mulf %12, %11 : vector<4x256xf32>
    %cst_10 = arith.constant 2.000000e+00 : f32
    %14 = math.sqrt %cst_10 : f32
    %15 = vector.broadcast %14 : f32 to vector<4x256xf32>
    %16 = arith.divf %11, %15 : vector<4x256xf32>
    %17 = math.erf %16 : vector<4x256xf32>
    %cst_11 = arith.constant 1.000000e+00 : f32
    %18 = vector.broadcast %cst_11 : f32 to vector<4x256xf32>
    %19 = arith.addf %18, %17 : vector<4x256xf32>
    %20 = arith.mulf %13, %19 : vector<4x256xf32>
    %c17_i32 = arith.constant 17 : i32
    %21 = tpu.dynamic_rotate %20 by %c17_i32 dim 1 : vector<4x256xf32>, i32 -> vector<4x256xf32>
    %c0_12 = arith.constant 0 : index
    %c0_13 = arith.constant 0 : index
    %c0_14 = arith.constant 0 : index
    %22 = vector.load %arg3[%c0_12, %c0_13, %c0_14] : memref<9x1x256xf32, #tpu.memory_space<vmem>>, vector<1x1x256xf32>
    %23 = vector.shape_cast %22 : vector<1x1x256xf32> to vector<1x256xf32>
    %24 = vector.broadcast %23 : vector<1x256xf32> to vector<4x256xf32>
    %25 = arith.mulf %21, %24 : vector<4x256xf32>
    %c0_15 = arith.constant 0 : index
    %c0_16 = arith.constant 0 : index
    %c0_17 = arith.constant 0 : index
    %26 = vector.load %arg5[%c0_15, %c0_16, %c0_17] : memref<9x4x4xbf16, #tpu.memory_space<vmem>>, vector<1x4x4xbf16>
    %27 = vector.shape_cast %26 : vector<1x4x4xbf16> to vector<4x4xbf16>
    %28 = arith.truncf %25 : vector<4x256xf32> to vector<4x256xbf16>
    %cst_18 = arith.constant dense<0.000000e+00> : vector<4x256xf32>
    %29 = tpu.matmul %27, %28, %cst_18 {dimension_numbers = #tpu.dot_dimension_numbers<[1], [0], [0], [1], [0, 0, 1, 1], [], []>} : vector<4x4xbf16>, vector<4x256xbf16>, vector<4x256xf32> -> vector<4x256xf32>
    %c16_i32 = arith.constant 16 : i32
    %30 = tpu.dynamic_rotate %20 by %c16_i32 dim 1 : vector<4x256xf32>, i32 -> vector<4x256xf32>
    %c1_19 = arith.constant 1 : index
    %c0_20 = arith.constant 0 : index
    %c0_21 = arith.constant 0 : index
    %31 = vector.load %arg3[%c1_19, %c0_20, %c0_21] : memref<9x1x256xf32, #tpu.memory_space<vmem>>, vector<1x1x256xf32>
    %32 = vector.shape_cast %31 : vector<1x1x256xf32> to vector<1x256xf32>
    %33 = vector.broadcast %32 : vector<1x256xf32> to vector<4x256xf32>
    %34 = arith.mulf %30, %33 : vector<4x256xf32>
    %c1_22 = arith.constant 1 : index
    %c0_23 = arith.constant 0 : index
    %c0_24 = arith.constant 0 : index
    %35 = vector.load %arg5[%c1_22, %c0_23, %c0_24] : memref<9x4x4xbf16, #tpu.memory_space<vmem>>, vector<1x4x4xbf16>
    %36 = vector.shape_cast %35 : vector<1x4x4xbf16> to vector<4x4xbf16>
    %37 = arith.truncf %34 : vector<4x256xf32> to vector<4x256xbf16>
    %cst_25 = arith.constant dense<0.000000e+00> : vector<4x256xf32>
    %38 = tpu.matmul %36, %37, %cst_25 {dimension_numbers = #tpu.dot_dimension_numbers<[1], [0], [0], [1], [0, 0, 1, 1], [], []>} : vector<4x4xbf16>, vector<4x256xbf16>, vector<4x256xf32> -> vector<4x256xf32>
    %39 = arith.addf %29, %38 : vector<4x256xf32>
    %c15_i32 = arith.constant 15 : i32
    %40 = tpu.dynamic_rotate %20 by %c15_i32 dim 1 : vector<4x256xf32>, i32 -> vector<4x256xf32>
    %c2_26 = arith.constant 2 : index
    %c0_27 = arith.constant 0 : index
    %c0_28 = arith.constant 0 : index
    %41 = vector.load %arg3[%c2_26, %c0_27, %c0_28] : memref<9x1x256xf32, #tpu.memory_space<vmem>>, vector<1x1x256xf32>
    %42 = vector.shape_cast %41 : vector<1x1x256xf32> to vector<1x256xf32>
    %43 = vector.broadcast %42 : vector<1x256xf32> to vector<4x256xf32>
    %44 = arith.mulf %40, %43 : vector<4x256xf32>
    %c2_29 = arith.constant 2 : index
    %c0_30 = arith.constant 0 : index
    %c0_31 = arith.constant 0 : index
    %45 = vector.load %arg5[%c2_29, %c0_30, %c0_31] : memref<9x4x4xbf16, #tpu.memory_space<vmem>>, vector<1x4x4xbf16>
    %46 = vector.shape_cast %45 : vector<1x4x4xbf16> to vector<4x4xbf16>
    %47 = arith.truncf %44 : vector<4x256xf32> to vector<4x256xbf16>
    %cst_32 = arith.constant dense<0.000000e+00> : vector<4x256xf32>
    %48 = tpu.matmul %46, %47, %cst_32 {dimension_numbers = #tpu.dot_dimension_numbers<[1], [0], [0], [1], [0, 0, 1, 1], [], []>} : vector<4x4xbf16>, vector<4x256xbf16>, vector<4x256xf32> -> vector<4x256xf32>
    %49 = arith.addf %39, %48 : vector<4x256xf32>
    %c1_i32 = arith.constant 1 : i32
    %50 = tpu.dynamic_rotate %20 by %c1_i32 dim 1 : vector<4x256xf32>, i32 -> vector<4x256xf32>
    %c3_33 = arith.constant 3 : index
    %c0_34 = arith.constant 0 : index
    %c0_35 = arith.constant 0 : index
    %51 = vector.load %arg3[%c3_33, %c0_34, %c0_35] : memref<9x1x256xf32, #tpu.memory_space<vmem>>, vector<1x1x256xf32>
    %52 = vector.shape_cast %51 : vector<1x1x256xf32> to vector<1x256xf32>
    %53 = vector.broadcast %52 : vector<1x256xf32> to vector<4x256xf32>
    %54 = arith.mulf %50, %53 : vector<4x256xf32>
    %c3_36 = arith.constant 3 : index
    %c0_37 = arith.constant 0 : index
    %c0_38 = arith.constant 0 : index
    %55 = vector.load %arg5[%c3_36, %c0_37, %c0_38] : memref<9x4x4xbf16, #tpu.memory_space<vmem>>, vector<1x4x4xbf16>
    %56 = vector.shape_cast %55 : vector<1x4x4xbf16> to vector<4x4xbf16>
    %57 = arith.truncf %54 : vector<4x256xf32> to vector<4x256xbf16>
    %cst_39 = arith.constant dense<0.000000e+00> : vector<4x256xf32>
    %58 = tpu.matmul %56, %57, %cst_39 {dimension_numbers = #tpu.dot_dimension_numbers<[1], [0], [0], [1], [0, 0, 1, 1], [], []>} : vector<4x4xbf16>, vector<4x256xbf16>, vector<4x256xf32> -> vector<4x256xf32>
    %59 = arith.addf %49, %58 : vector<4x256xf32>
    %c4 = arith.constant 4 : index
    %c0_40 = arith.constant 0 : index
    %c0_41 = arith.constant 0 : index
    %60 = vector.load %arg5[%c4, %c0_40, %c0_41] : memref<9x4x4xbf16, #tpu.memory_space<vmem>>, vector<1x4x4xbf16>
    %61 = vector.shape_cast %60 : vector<1x4x4xbf16> to vector<4x4xbf16>
    %62 = arith.truncf %20 : vector<4x256xf32> to vector<4x256xbf16>
    %cst_42 = arith.constant dense<0.000000e+00> : vector<4x256xf32>
    %63 = tpu.matmul %61, %62, %cst_42 {dimension_numbers = #tpu.dot_dimension_numbers<[1], [0], [0], [1], [0, 0, 1, 1], [], []>} : vector<4x4xbf16>, vector<4x256xbf16>, vector<4x256xf32> -> vector<4x256xf32>
    %64 = arith.addf %59, %63 : vector<4x256xf32>
    %c255_i32 = arith.constant 255 : i32
    %65 = tpu.dynamic_rotate %20 by %c255_i32 dim 1 : vector<4x256xf32>, i32 -> vector<4x256xf32>
    %c5 = arith.constant 5 : index
    %c0_43 = arith.constant 0 : index
    %c0_44 = arith.constant 0 : index
    %66 = vector.load %arg3[%c5, %c0_43, %c0_44] : memref<9x1x256xf32, #tpu.memory_space<vmem>>, vector<1x1x256xf32>
    %67 = vector.shape_cast %66 : vector<1x1x256xf32> to vector<1x256xf32>
    %68 = vector.broadcast %67 : vector<1x256xf32> to vector<4x256xf32>
    %69 = arith.mulf %65, %68 : vector<4x256xf32>
    %c5_45 = arith.constant 5 : index
    %c0_46 = arith.constant 0 : index
    %c0_47 = arith.constant 0 : index
    %70 = vector.load %arg5[%c5_45, %c0_46, %c0_47] : memref<9x4x4xbf16, #tpu.memory_space<vmem>>, vector<1x4x4xbf16>
    %71 = vector.shape_cast %70 : vector<1x4x4xbf16> to vector<4x4xbf16>
    %72 = arith.truncf %69 : vector<4x256xf32> to vector<4x256xbf16>
    %cst_48 = arith.constant dense<0.000000e+00> : vector<4x256xf32>
    %73 = tpu.matmul %71, %72, %cst_48 {dimension_numbers = #tpu.dot_dimension_numbers<[1], [0], [0], [1], [0, 0, 1, 1], [], []>} : vector<4x4xbf16>, vector<4x256xbf16>, vector<4x256xf32> -> vector<4x256xf32>
    %74 = arith.addf %64, %73 : vector<4x256xf32>
    %c241_i32 = arith.constant 241 : i32
    %75 = tpu.dynamic_rotate %20 by %c241_i32 dim 1 : vector<4x256xf32>, i32 -> vector<4x256xf32>
    %c6 = arith.constant 6 : index
    %c0_49 = arith.constant 0 : index
    %c0_50 = arith.constant 0 : index
    %76 = vector.load %arg3[%c6, %c0_49, %c0_50] : memref<9x1x256xf32, #tpu.memory_space<vmem>>, vector<1x1x256xf32>
    %77 = vector.shape_cast %76 : vector<1x1x256xf32> to vector<1x256xf32>
    %78 = vector.broadcast %77 : vector<1x256xf32> to vector<4x256xf32>
    %79 = arith.mulf %75, %78 : vector<4x256xf32>
    %c6_51 = arith.constant 6 : index
    %c0_52 = arith.constant 0 : index
    %c0_53 = arith.constant 0 : index
    %80 = vector.load %arg5[%c6_51, %c0_52, %c0_53] : memref<9x4x4xbf16, #tpu.memory_space<vmem>>, vector<1x4x4xbf16>
    %81 = vector.shape_cast %80 : vector<1x4x4xbf16> to vector<4x4xbf16>
    %82 = arith.truncf %79 : vector<4x256xf32> to vector<4x256xbf16>
    %cst_54 = arith.constant dense<0.000000e+00> : vector<4x256xf32>
    %83 = tpu.matmul %81, %82, %cst_54 {dimension_numbers = #tpu.dot_dimension_numbers<[1], [0], [0], [1], [0, 0, 1, 1], [], []>} : vector<4x4xbf16>, vector<4x256xbf16>, vector<4x256xf32> -> vector<4x256xf32>
    %84 = arith.addf %74, %83 : vector<4x256xf32>
    %c240_i32 = arith.constant 240 : i32
    %85 = tpu.dynamic_rotate %20 by %c240_i32 dim 1 : vector<4x256xf32>, i32 -> vector<4x256xf32>
    %c7 = arith.constant 7 : index
    %c0_55 = arith.constant 0 : index
    %c0_56 = arith.constant 0 : index
    %86 = vector.load %arg3[%c7, %c0_55, %c0_56] : memref<9x1x256xf32, #tpu.memory_space<vmem>>, vector<1x1x256xf32>
    %87 = vector.shape_cast %86 : vector<1x1x256xf32> to vector<1x256xf32>
    %88 = vector.broadcast %87 : vector<1x256xf32> to vector<4x256xf32>
    %89 = arith.mulf %85, %88 : vector<4x256xf32>
    %c7_57 = arith.constant 7 : index
    %c0_58 = arith.constant 0 : index
    %c0_59 = arith.constant 0 : index
    %90 = vector.load %arg5[%c7_57, %c0_58, %c0_59] : memref<9x4x4xbf16, #tpu.memory_space<vmem>>, vector<1x4x4xbf16>
    %91 = vector.shape_cast %90 : vector<1x4x4xbf16> to vector<4x4xbf16>
    %92 = arith.truncf %89 : vector<4x256xf32> to vector<4x256xbf16>
    %cst_60 = arith.constant dense<0.000000e+00> : vector<4x256xf32>
    %93 = tpu.matmul %91, %92, %cst_60 {dimension_numbers = #tpu.dot_dimension_numbers<[1], [0], [0], [1], [0, 0, 1, 1], [], []>} : vector<4x4xbf16>, vector<4x256xbf16>, vector<4x256xf32> -> vector<4x256xf32>
    %94 = arith.addf %84, %93 : vector<4x256xf32>
    %c239_i32 = arith.constant 239 : i32
    %95 = tpu.dynamic_rotate %20 by %c239_i32 dim 1 : vector<4x256xf32>, i32 -> vector<4x256xf32>
    %c8 = arith.constant 8 : index
    %c0_61 = arith.constant 0 : index
    %c0_62 = arith.constant 0 : index
    %96 = vector.load %arg3[%c8, %c0_61, %c0_62] : memref<9x1x256xf32, #tpu.memory_space<vmem>>, vector<1x1x256xf32>
    %97 = vector.shape_cast %96 : vector<1x1x256xf32> to vector<1x256xf32>
    %98 = vector.broadcast %97 : vector<1x256xf32> to vector<4x256xf32>
    %99 = arith.mulf %95, %98 : vector<4x256xf32>
    %c8_63 = arith.constant 8 : index
    %c0_64 = arith.constant 0 : index
    %c0_65 = arith.constant 0 : index
    %100 = vector.load %arg5[%c8_63, %c0_64, %c0_65] : memref<9x4x4xbf16, #tpu.memory_space<vmem>>, vector<1x4x4xbf16>
    %101 = vector.shape_cast %100 : vector<1x4x4xbf16> to vector<4x4xbf16>
    %102 = arith.truncf %99 : vector<4x256xf32> to vector<4x256xbf16>
    %cst_66 = arith.constant dense<0.000000e+00> : vector<4x256xf32>
    %103 = tpu.matmul %101, %102, %cst_66 {dimension_numbers = #tpu.dot_dimension_numbers<[1], [0], [0], [1], [0, 0, 1, 1], [], []>} : vector<4x4xbf16>, vector<4x256xbf16>, vector<4x256xf32> -> vector<4x256xf32>
    %104 = arith.addf %94, %103 : vector<4x256xf32>
    %105 = vector.broadcast %2 : vector<4x1xf32> to vector<4x256xf32>
    %106 = arith.mulf %104, %105 : vector<4x256xf32>
    %107 = vector.broadcast %3 : vector<4x1xf32> to vector<4x256xf32>
    %108 = arith.addf %106, %107 : vector<4x256xf32>
    %c0_67 = arith.constant 0 : index
    %c0_68 = arith.constant 0 : index
    %c0_69 = arith.constant 0 : index
    %109 = vector.load %arg2[%c0_67, %c0_68, %c0_69] : memref<1x4x256xf32, #tpu.memory_space<vmem>>, vector<1x4x256xf32>
    %110 = vector.shape_cast %109 : vector<1x4x256xf32> to vector<4x256xf32>
    %111 = arith.addf %108, %110 : vector<4x256xf32>
    %cst_70 = arith.constant 5.000000e-01 : f32
    %112 = vector.broadcast %cst_70 : f32 to vector<4x256xf32>
    %113 = arith.mulf %112, %111 : vector<4x256xf32>
    %cst_71 = arith.constant 2.000000e+00 : f32
    %114 = math.sqrt %cst_71 : f32
    %115 = vector.broadcast %114 : f32 to vector<4x256xf32>
    %116 = arith.divf %111, %115 : vector<4x256xf32>
    %117 = math.erf %116 : vector<4x256xf32>
    %cst_72 = arith.constant 1.000000e+00 : f32
    %118 = vector.broadcast %cst_72 : f32 to vector<4x256xf32>
    %119 = arith.addf %118, %117 : vector<4x256xf32>
    %120 = arith.mulf %113, %119 : vector<4x256xf32>
    %c0_73 = arith.constant 0 : index
    %c0_74 = arith.constant 0 : index
    %c0_75 = arith.constant 0 : index
    %121 = vector.load %arg7[%c0_73, %c0_74, %c0_75] : memref<1x4x256xf32, #tpu.memory_space<vmem>>, vector<1x4x256xf32>
    %122 = vector.shape_cast %121 : vector<1x4x256xf32> to vector<4x256xf32>
    %123 = vector.shape_cast %120 : vector<4x256xf32> to vector<1x4x256xf32>
    tpu.vector_store %arg7[%c0_73, %c0_74, %c0_75], %123 {strides = array<i32>} : memref<1x4x256xf32, #tpu.memory_space<vmem>>, vector<1x4x256xf32>,
    return
  }
  func.func @transform_0(%arg0: i32) -> (i32, i32, i32) {
    %c0_i32 = arith.constant 0 : i32
    %c0_i32_0 = arith.constant 0 : i32
    %c0_i32_1 = arith.constant 0 : i32
    return %arg0, %c0_i32, %c0_i32_0 : i32, i32, i32
  }
  func.func @transform_1(%arg0: i32) -> (i32, i32, i32) {
    %c0_i32 = arith.constant 0 : i32
    %c0_i32_0 = arith.constant 0 : i32
    %c0_i32_1 = arith.constant 0 : i32
    return %arg0, %c0_i32, %c0_i32_0 : i32, i32, i32
  }
  func.func @transform_2(%arg0: i32) -> (i32, i32, i32) {
    %c0_i32 = arith.constant 0 : i32
    %c0_i32_0 = arith.constant 0 : i32
    %c0_i32_1 = arith.constant 0 : i32
    %c0_i32_2 = arith.constant 0 : i32
    return %c0_i32, %c0_i32_0, %c0_i32_1 : i32, i32, i32
  }
  func.func @transform_3(%arg0: i32) -> (i32, i32) {
    %c0_i32 = arith.constant 0 : i32
    %c0_i32_0 = arith.constant 0 : i32
    %c0_i32_1 = arith.constant 0 : i32
    return %c0_i32, %c0_i32_0 : i32, i32
  }
  func.func @transform_4(%arg0: i32) -> (i32, i32, i32) {
    %c0_i32 = arith.constant 0 : i32
    %c0_i32_0 = arith.constant 0 : i32
    %c0_i32_1 = arith.constant 0 : i32
    %c0_i32_2 = arith.constant 0 : i32
    return %c0_i32, %c0_i32_0, %c0_i32_1 : i32, i32, i32
  }
  func.func @transform_5(%arg0: i32) -> (i32, i32) {
    %c0_i32 = arith.constant 0 : i32
    %c0_i32_0 = arith.constant 0 : i32
    %c0_i32_1 = arith.constant 0 : i32
    return %c0_i32, %c0_i32_0 : i32, i32
  }
  func.func @transform_6(%arg0: i32) -> (i32, i32, i32) {
    %c0_i32 = arith.constant 0 : i32
    %c0_i32_0 = arith.constant 0 : i32
    %c0_i32_1 = arith.constant 0 : i32
    return %arg0, %c0_i32, %c0_i32_0 : i32, i32, i32
  }
}

</mosaic_0001>

<bundles_post_ra>
// kernel: tpu_custom_call.1
= control target key start
LH: loop header
LB: loop body
LE: loop exit
PB: predicated region body
PF: predicated region fallthrough
CT: control target
= control target key end

     0   :  { %11 = vsyncpa [#allocation3], 0  ;;  %s1738_s0 = inlined_call_operand.vmem [shape: bf16[2,36,256], index: 0, kind: input, shape index: {}]   ;;  %s1739_s1 = inlined_call_operand.vmem [shape: f32[2,4,256], index: 1, kind: input, shape index: {}]   ;;  %s1740_s2 = inlined_call_operand.vmem [shape: f32[9,1,256], index: 2, kind: input, shape index: {}]   ;;  %s1741_s3 = inlined_call_operand.vmem [shape: bf16[4,36], index: 3, kind: input, shape index: {}]   ;;  %s1742_s4 = inlined_call_operand.vmem [shape: bf16[9,4,4], index: 4, kind: input, shape index: {}]   ;;  %s1743_s5 = inlined_call_operand.vmem [shape: f32[4,4], index: 5, kind: input, shape index: {}]   ;;  %s1744_s6 = inlined_call_operand.hbm [shape: f32[2,4,256], index: 6, kind: output, shape index: {}]  }
   0x1   :  { %13 = vsyncpa [#allocation3 + $0x1], 0  ;;  %s1446_s21 = smov 0   ;;  %s1448_s22 = smov 0  }
   0x2   :  { %s1450_s23 = smov 0   ;;  %s1452_s24 = smov 0  }
   0x3 LB: > { %s1467_s25 = sadd.s32 4294967295, %s1396_s24   ;;  %s1175_s26 = sadd.s32 4294967294, %s1396_s24   ;;  %s1396_s24 = sphi %s1452_s24, %s1750_s24   ;;  %s1392_s23 = sphi %s1450_s23, %s1749_s23   ;;  %s1388_s22 = sphi %s1448_s22, %s1748_s22   ;;  %s1384_s21 = sphi %s1446_s21, %s1747_s21  }
   0x4   : > { %s1471_s27 = sadd.s32 1, %s1396_s24   ;;  %s162_s28 = sadd.s32 1, %s1392_s23 }
   0x5   : > { %s159_s29 = ssub.s32 %s1396_s24, %s1471_s27  ;;  %p172_p0 = scmp.ne.s32.totalorder %s1392_s23, %s1388_s22 }
   0x6   : > { %p160_p1 = scmp.eq.s32.totalorder %s159_s29, 0  ;;  %p173_p2 = scmp.eq.s32.totalorder %s1467_s25, 1 }
   0x7   : > { %p178_p3 = scmp.ne.s32.totalorder %s1388_s22, %s1384_s21  ;;  %p179_p4 = scmp.eq.s32.totalorder %s1175_s26, 1 }
   0x8   : > { %s1482_s30 = scalar_select %p160_p1, %s1392_s23, %s162_s28  }
   0x9   : > { %p1484_p5 = por %p173_p2, %p172_p0  ;;  %p1488_p6 = por %p179_p4, %p178_p3 }
   0xa   : > { %p1178_p7 = scmp.ge.s32.totalorder %s1396_s24, 1  ;;  %p225_p8 = scmp.lt.s32.totalorder %s1396_s24, 3 }
   0xc   : > { %p226_p9 = pnand %p1178_p7, %p225_p8 }
   0xd   : > { %p260_p10 = scmp.lt.s32.totalorder (!%p226_p9), %s1467_s25, 1  ;;  %v1398_v0 = vmov (!%p226_p9), 0   ;;  %v1500_v1 = vld [vmem:[%s1743_s5] sm:$0xf] (!%p226_p9)  ;;  %v1399_v2 = vmov (!%p226_p9), 1   ;;  %vm307_vm0 = vcmask (!%p226_p9), 1041408   ;;  %v383_v34 = vlaneseq (!%p226_p9) }
   0xe   : > { %229 = sbr.rel (%p226_p9) target bundleno = 714 (0x2ca), region = 44  ;;  %346 = vmatprep.mubr.bf16.mxu0 (!%p226_p9), %v1398_v0  ;;  %1313 = vset.pattern.permute.xlu0 (!%p226_p9), %v1398_v0  ;;  %v272_v11 = vld [vmem:[%s1741_s3] sm:$0x3] (!%p226_p9)  ;;  %vm303_vm1 = vcmask (!%p226_p9), 293888   ;;  %s1400_s18 = smov (!%p226_p9), 1   ;;  %v1408_v32 = vmov (!%p226_p9), 2  }
   0xf   : > { %357 = vperm.xlu0 (!%p226_p9), %1313, %v1500_v1   ;;  %677 = vmatprep.mubr.bf16.mxu1 (!%p226_p9), %v1398_v0  ;;  %s1401_s19 = smov (!%p226_p9), 127   ;;  %s1402_s20 = smov (!%p226_p9), 16   ;;  %v1409_v33 = vmov (!%p226_p9), 3   ;;  %v391_v35 = vshrl.u32 (!%p226_p9), %v383_v34, 7  ;;  %v1540_v36 = vand.u32 (!%p226_p9), 127, %v383_v34  ;;  %vm431_vm5 = vcmask (!%p226_p9), 31744  }
  0x10   : > { %s1403_s26 = smov (!%p226_p9), 113   ;;  %s1404_s28 = smov (!%p226_p9), 17   ;;  %1315 = vset.pattern.permute.xlu1 (!%p226_p9), %v1408_v32  ;;  %v1201_v39 = vld [vmem:[%s1740_s2 + $0x6] sm:$0x3] (!%p226_p9)  ;;  %v1208_v44 = vld [vmem:[%s1740_s2 + $0xa] sm:$0x3] (!%p226_p9) }
  0x11   : > { %s1405_s29 = smov (!%p226_p9), 112   ;;  %s1406_s9 = smov (!%p226_p9), 15   ;;  %v1542_v37 = vsub.s32 (!%p226_p9), 0, %v391_v35  ;;  %v1544_v38 = vsub.s32 (!%p226_p9), 1, %v391_v35  ;;  %vm614_vm2 = vcmp.lt.s32.totalorder (!%p226_p9), %v1540_v36, 1  ;;  %vm748_vm3 = vcmp.lt.s32.totalorder (!%p226_p9), %v1540_v36, 127 }
  0x12   : > { %s1407_s10 = smov (!%p226_p9), 111   ;;  %v1191_v52 = vld [vmem:[%s1740_s2 + $0x2] sm:$0x3] (!%p226_p9)  ;;  %vm409_vm4 = vcmp.lt.s32.totalorder (!%p226_p9), %v1540_v36, 16  ;;  %vm826_vm6 = vcmp.lt.s32.totalorder (!%p226_p9), %v1540_v36, 113  ;;  %vm385_vm7 = vcmp.lt.s32.totalorder (!%p226_p9), %v1540_v36, 17 }
  0x13   : > { %1314 = vset.pattern.permute.xlu0 (!%p226_p9), %v1399_v2  ;;  %v623_v42 = vrot.slane (!%p226_p9), %v1201_v39, %v1542_v37  ;;  %v627_v43 = vrot.slane (!%p226_p9), %v1201_v39, %v1544_v38  ;;  %v761_v50 = vrot.slane (!%p226_p9), %v1208_v44, %v1544_v38  ;;  %v418_v57 = vrot.slane (!%p226_p9), %v1191_v52, %v1542_v37  ;;  %v1197_v32 = vld [vmem:[%s1740_s2 + $0x4] sm:$0x3] (!%p226_p9) }
  0x14   : > { %363 = vperm.xlu0 (!%p226_p9), %1314, %v1500_v1   ;;  %v422_v58 = vrot.slane (!%p226_p9), %v1191_v52, %v1544_v38  ;;  %vm536_vm8 = vcmp.lt.s32.totalorder (!%p226_p9), %v1540_v36, 15  ;;  %vm904_vm9 = vcmp.lt.s32.totalorder (!%p226_p9), %v1540_v36, 112  ;;  %vm982_vm10 = vcmp.lt.s32.totalorder (!%p226_p9), %v1540_v36, 111  ;;  %v1221_v36 = vld [vmem:[%s1742_s4 + $0x10] sm:$0x3] (!%p226_p9) }
  0x15   : > { %s1503_s11 = scalar_select %p260_p10, %s1467_s25, 1 }
  0x17   : > { %s1261_s12 = smul.u32 40, %s1503_s11 }
  0x18   : > { %1316 = vset.pattern.permute.xlu0 %v1409_v33  ;;  %v1205_v33 = vld [vmem:[%s1742_s4 + $0x8] sm:$0x3] }
  0x19   : > { %s264_s15 = scalar_lea.vmem %s1738_s0, %s1261_s12 }
  0x1a   : > { %v1317_v3 = vld [vmem:[%s264_s15 + $0x4] ss:$8 sps:$4 sm:$0xff]   ;;  %v1319_v4 = vld [vmem:[%s264_s15] ss:$8 sps:$4 sm:$0xff]   ;;  %v1320_v5 = vld [vmem:[%s264_s15 + $0x14] ss:$8 sps:$4 sm:$0xff]  }
  0x1b   : > { %314 = vmatprep.subr.bf16.mxu0 %v1317_v3  ;;  %v277_v6 = vld [vmem:[%s264_s15 + $0x20] sm:$0x33]  ;;  %v1322_v7 = vld [vmem:[%s264_s15 + $0x10] ss:$8 sps:$4 sm:$0xff]   ;;  %v757_v3 = vrot.slane %v1208_v44, %v1542_v37 }
  0x1c   : > { %315 = vmatpush1.bf16.msra.mxu0 %v1319_v4  ;;  %v1188_v8 = vcombine.high %v277_v6, %v277_v6  ;;  %v1187_v9 = vcombine.low %v277_v6, %v277_v6 }
  0x1d   : > { %316 = vmatprep.subr.bf16.mxu0 %v1320_v5 }
  0x1e   : > { %v309_v10 = vsel %vm307_vm0, %v1187_v9, 0 }
  0x20   : > { %317 = vmatpush1.bf16.msra.mxu0 %v1322_v7 }
  0x21   : > { %1189 = vmatprep.subr.msk.bf16.mxu0 %vm307_vm0, %v1188_v8 }
  0x24   : > { %319 = vmatpush1.bf16.msra.mxu0 %v309_v10  ;;  %v1212_v10 = vld [vmem:[%s1740_s2 + $0xc] sm:$0x3] }
  0x27   : > { %1190 = vmatmul.mubr.msk.bf16.vlgmr.msra.gmra.mrb[0].mxu0 %vm303_vm1, %v272_v11 }
  0x28   : > { %473 = vmatprep.mubr.bf16.mxu0 %v1398_v0 }
  0x8e   : > { %v358_v12 = vpop.permute.xlu0 %357 }
  0x93   : > { %v364_v14 = vpop.permute.xlu0 %363 }
  0xfa   : > { %v348_v13 = vpop.f32.mrb[0].mxu0 }
  0xfb   : > { %v360_v15 = vmul.f32 %v358_v12, %v348_v13  ;;  %v350_v16 = vpop.f32.mrb[1].mxu0 }
  0xfc   : > { %v361_v17 = vmul.f32 %v358_v12, %v350_v16  ;;  %v352_v18 = vpop.f32.mrb[2].mxu0  ;;  %v388_v12 = vld [vmem:[%s1740_s2] sm:$0x3] }
  0xfd   : > { %v366_v19 = vadd.f32 %v364_v14, %v360_v15  ;;  %v353_v20 = vpop.f32.mrb[3].mxu0 }
  0xfe   : > { %v367_v21 = vadd.f32 %v364_v14, %v361_v17  ;;  %v839_v17 = vrot.slane %v1212_v10, %v1544_v38  ;;  %v393_v20 = vrot.slane %v388_v12, %v1542_v37 }
  0xff   : > { %v371_v22 = vmul.f32 0.70710677, %v366_v19  ;;  %v368_v26 = vmul.f32 0.5, %v366_v19 }
 0x100   : > { %v372_v23 = vmul.f32 0.70710677, %v367_v21  ;;  %v369_v28 = vmul.f32 0.5, %v367_v21  ;;  %v397_v21 = vrot.slane %v388_v12, %v1544_v38 }
 0x101   : > { %1326 = verf.f32 %v371_v22 }
 0x102   : > { %1328 = verf.f32 %v372_v23  ;;  %v1192_v23 = vld [vmem:[%s1742_s4 + $0x2] sm:$0x3] }
 0x10b   : > { %v1327_v24 = vpop.eup %1326 }
 0x10c   : > { %v1329_v25 = vpop.eup %1328  ;;  %v375_v27 = vadd.f32 1.0, %v1327_v24 }
 0x10d   : > { %v376_v29 = vadd.f32 1.0, %v1329_v25 }
 0x10e   : > { %v1518_v30 = vmul.f32 %v375_v27, %v368_v26 }
 0x10f   : > { %v1520_v31 = vmul.f32 %v376_v29, %v369_v28 }
 0x110   : > { %610 = vrot.lane.b32.xlu1 %v1518_v30, %s1400_s18  ;;  %v690_v63 = vpack.c.bf16 %v1518_v30, %v1518_v30 }
 0x111   : > { %746 = vrot.lane.b32.xlu0 %v1520_v31, %s1401_s19  ;;  %v691_v62 = vpack.c.bf16 %v1520_v31, %v1520_v31 }
 0x112   : > { %v696_v9 = vsel %vm307_vm0, %v690_v63, 0  ;;  %v1209_v63 = vld [vmem:[%s1742_s4 + $0xa] sm:$0x3] }
 0x114   : > { %612 = vrot.lane.b32.xlu1 %v1520_v31, %s1400_s18  ;;  %s1229_s18 = sshll.u32 %s1503_s11, 3  ;;  %s257_s11 = sand.u32 1, %s1388_s22  }
 0x115   : > { %407 = vrot.lane.b32.xlu0 %v1520_v31, %s1402_s20  ;;  %s1090_s15 = scalar_lea.sflag [#allocation3], %s257_s11 }
 0x118   : > { %744 = vrot.lane.b32.xlu1 %v1518_v30, %s1401_s19 }
 0x119   : > { %824 = vrot.lane.b32.xlu0 %v1520_v31, %s1403_s26 }
 0x11c   : > { %405 = vrot.lane.b32.xlu1 %v1518_v30, %s1402_s20 }
 0x11d   : > { %381 = vrot.lane.b32.xlu0 %v1520_v31, %s1404_s28 }
 0x120   : > { %822 = vrot.lane.b32.xlu1 %v1518_v30, %s1403_s26  ;;  %s269_s26 = scalar_lea.vmem %s1739_s1, %s1229_s18 }
 0x121   : > { %902 = vrot.lane.b32.xlu0 %v1520_v31, %s1405_s29 }
 0x124   : > { %379 = vrot.lane.b32.xlu1 %v1518_v30, %s1404_s28  ;;  %s1179_s28 = sshll.u32 %s257_s11, 3 }
 0x125   : > { %534 = vrot.lane.b32.xlu0 %v1520_v31, %s1406_s9 }
 0x128   : > { %900 = vrot.lane.b32.xlu1 %v1518_v30, %s1405_s29  ;;  %s1230_s29 = sshll.u32 %s1467_s25, 7  ;;  %s1410_s25 = smov [#allocation2]  }
 0x129   : > { %980 = vrot.lane.b32.xlu0 %v1520_v31, %s1407_s10  ;;  %s1696_s14 = scalar_lea.hbm %s1744_s6, %s1230_s29  ;;  %s1338_s17 = sshll.u32 %s1410_s25, 4  ;;  %s1339_s17 = int_to_ptr.vmem [resolvable:$false] %s1338_s17 }
 0x12a   : > { %s1340_s18 = scalar_lea.vmem %s1339_s17, 256 }
 0x12c   : > { %532 = vrot.lane.b32.xlu1 %v1518_v30, %s1406_s9  ;;  %s259_s9 = scalar_lea.vmem [#allocation2], %s1179_s28 }
 0x12d   : > { %1063 = vperm.xlu0 %1316, %v1500_v1  }
 0x130   : > { %978 = vrot.lane.b32.xlu1 %v1518_v30, %s1407_s10  ;;  %s1104_s10 = sshll.u32 %s259_s9, 4  ;;  %s1698_s10 = int_to_ptr.vmem [resolvable:$true] %s1104_s10 }
 0x131   : > { %s1334_s16 = scalar_lea.vmem %s1698_s10, 128  ;;  %p1341_p0 = scmp.lt.s32.totalorder %s1698_s10, %s1339_s17 }
 0x132   : > { %p1335_p11 = scmp.ne.s32.totalorder %s1698_s10, %s1334_s16  ;;  %p1342_p1 = scmp.lt.s32.totalorder %s1340_s18, %s1334_s16 }
 0x134   : > { %1057 = vperm.xlu1 %1315, %v1500_v1   ;;  %v1202_v1 = vld [vmem:[%s1742_s4 + $0x6] sm:$0x3]  ;;  %p1336_p12 = pnand %p1335_p11, %p1484_p5  ;;  %p1343_p2 = por %p1342_p1, %p1341_p0 }
 0x136   : > { %p1337_p13 = pneg %p1336_p12 }
 0x138   : > { %p1344_p3 = pnand %p1343_p2, %p1337_p13 }
 0x182   : > { %v611_v40 = vpop.permute.xlu1 %610 }
 0x183   : > { %v747_v41 = vpop.permute.xlu0 %746 }
 0x186   : > { %v613_v45 = vpop.permute.xlu1 %612 }
 0x187   : > { %v615_v46 = vsel %vm614_vm2, %v611_v40, %v613_v45  ;;  %v616_v47 = vsel %vm614_vm2, %v613_v45, %v611_v40  ;;  %v408_v48 = vpop.permute.xlu0 %407  ;;  %v835_v40 = vrot.slane %v1212_v10, %v1542_v37  ;;  %v549_v45 = vrot.slane %v1197_v32, %v1544_v38 }
 0x188   : > { %v630_v49 = vmul.f32 %v623_v42, %v616_v47  ;;  %v631_v51 = vmul.f32 %v627_v43, %v615_v46  ;;  %v1216_v47 = vld [vmem:[%s1740_s2 + $0xe] sm:$0x3] }
 0x18a   : > { %v745_v53 = vpop.permute.xlu1 %744  ;;  %v635_v54 = vpack.c.bf16 %v631_v51, %v631_v51  ;;  %v634_v55 = vpack.c.bf16 %v630_v49, %v630_v49 }
 0x18b   : > { %v750_v56 = vsel %vm748_vm3, %v747_v41, %v745_v53  ;;  %v1565_v60 = vpop.permute.xlu0 %824  ;;  %v749_v11 = vsel %vm748_vm3, %v745_v53, %v747_v41  ;;  %v545_v41 = vrot.slane %v1197_v32, %v1542_v37  ;;  %v917_v53 = vrot.slane %v1216_v47, %v1544_v38 }
 0x18c   : > { %v765_v59 = vmul.f32 %v761_v50, %v750_v56  ;;  %1203 = vmatprep.subr.msk.bf16.mxu1 %vm307_vm0, %v635_v54  ;;  %v640_v61 = vsel %vm307_vm0, %v634_v55, 0  ;;  %v764_v18 = vmul.f32 %v757_v3, %v749_v11  ;;  %v1198_v11 = vld [vmem:[%s1742_s4 + $0x4] sm:$0x3] }
 0x18d   : > { %646 = vmatpush1.bf16.msra.mxu1 %v640_v61 }
 0x18e   : > { %v406_v2 = vpop.permute.xlu1 %405  ;;  %1206 = vmatprep.subr.msk.bf16.mxu1 %vm307_vm0, %v691_v62  ;;  %v769_v6 = vpack.c.bf16 %v765_v59, %v765_v59  ;;  %v768_v27 = vpack.c.bf16 %v764_v18, %v764_v18 }
 0x18f   : > { %v410_v4 = vsel %vm409_vm4, %v406_v2, %v408_v48  ;;  %v411_v5 = vsel %vm409_vm4, %v408_v48, %v406_v2  ;;  %v382_v15 = vpop.permute.xlu0 %381 }
 0x190   : > { %v425_v7 = vmul.f32 %v418_v57, %v411_v5  ;;  %v426_v8 = vmul.f32 %v422_v58, %v410_v4  ;;  %1204 = vmatmul.mubr.msk.bf16.vlgmr.msra.gmra.mrb[0].mxu1 %vm431_vm5, %v1202_v1  ;;  %v774_v43 = vsel %vm307_vm0, %v768_v27, 0  ;;  %v402_v57 = vld [vmem:[%s1742_s4] sm:$0x3]  ;;  %v913_v1 = vrot.slane %v1216_v47, %v1542_v37  ;;  %v1220_v5 = vld [vmem:[%s1740_s2 + $0x10] sm:$0x3] }
 0x191   : > { %702 = vmatpush1.bf16.msra.mxu1 %v696_v9  ;;  %733 = vmatprep.mubr.bf16.mxu1 %v1398_v0  ;;  %v995_v9 = vrot.slane %v1220_v5, %v1544_v38 }
 0x192   : > { %v429_v13 = vpack.c.bf16 %v425_v7, %v425_v7  ;;  %v430_v14 = vpack.c.bf16 %v426_v8, %v426_v8  ;;  %v823_v16 = vpop.permute.xlu1 %822  ;;  %1210 = vmatprep.subr.msk.bf16.mxu1 %vm307_vm0, %v769_v6 }
 0x193   : > { %v828_v22 = vsel %vm826_vm6, %v1565_v60, %v823_v16  ;;  %v903_v29 = vpop.permute.xlu0 %902  ;;  %v827_v46 = vsel %vm826_vm6, %v823_v16, %v1565_v60 }
 0x194   : > { %1193 = vmatprep.subr.msk.bf16.mxu0 %vm307_vm0, %v430_v14  ;;  %v436_v19 = vsel %vm307_vm0, %v429_v13, 0  ;;  %v843_v28 = vmul.f32 %v839_v17, %v828_v22  ;;  %v842_v52 = vmul.f32 %v835_v40, %v827_v46  ;;  %v1213_v14 = vld [vmem:[%s1742_s4 + $0xc] sm:$0x3] }
 0x195   : > { %442 = vmatpush1.bf16.msra.mxu0 %v436_v19 }
 0x196   : > { %v380_v24 = vpop.permute.xlu1 %379  ;;  %v847_v42 = vpack.c.bf16 %v843_v28, %v843_v28  ;;  %v846_v60 = vpack.c.bf16 %v842_v52, %v842_v52 }
 0x197   : > { %v386_v25 = vsel %vm385_vm7, %v380_v24, %v382_v15  ;;  %v387_v26 = vsel %vm385_vm7, %v382_v15, %v380_v24  ;;  %v535_v48 = vpop.permute.xlu0 %534  ;;  %v991_v15 = vrot.slane %v1220_v5, %v1542_v37  ;;  %v1217_v37 = vld [vmem:[%s1742_s4 + $0xe] sm:$0x3] }
 0x198   : > { %v400_v30 = vmul.f32 %v393_v20, %v387_v26  ;;  %v401_v31 = vmul.f32 %v397_v21, %v386_v25  ;;  %1194 = vmatmul.mubr.msk.bf16.vlgmr.msra.gmra.mrb[4].mxu0 %vm431_vm5, %v1192_v23  ;;  %v852_v3 = vsel %vm307_vm0, %v846_v60, 0 }
 0x199   : > { %523 = vmatprep.mubr.bf16.mxu0 %v1398_v0 }
 0x19a   : > { %v403_v34 = vpack.c.bf16 %v400_v30, %v400_v30  ;;  %v404_v35 = vpack.c.bf16 %v401_v31, %v401_v31  ;;  %v901_v39 = vpop.permute.xlu1 %900 }
 0x19b   : > { %v906_v56 = vsel %vm904_vm9, %v903_v29, %v901_v39  ;;  %v905_v4 = vsel %vm904_vm9, %v901_v39, %v903_v29  ;;  %v981_v8 = vpop.permute.xlu0 %980 }
 0x19c   : > { %1195 = vmatprep.subr.msk.bf16.mxu0 %vm307_vm0, %v404_v35  ;;  %1207 = vmatmul.mubr.msk.bf16.vlgmr.msra.gmra.mrb[0].mxu1 %vm431_vm5, %v1205_v33  ;;  %v486_v44 = vsel %vm307_vm0, %v403_v34, 0  ;;  %v921_v61 = vmul.f32 %v917_v53, %v906_v56  ;;  %v920_v7 = vmul.f32 %v913_v1, %v905_v4 }
 0x19d   : > { %780 = vmatpush1.bf16.msra.mxu1 %v774_v43  ;;  %492 = vmatpush1.bf16.msra.mxu0 %v486_v44 }
 0x19e   : > { %1214 = vmatprep.subr.msk.bf16.mxu1 %vm307_vm0, %v847_v42  ;;  %v533_v49 = vpop.permute.xlu1 %532  ;;  %811 = vmatprep.mubr.bf16.mxu1 %v1398_v0  ;;  %v925_v2 = vpack.c.bf16 %v921_v61, %v921_v61  ;;  %v924_v12 = vpack.c.bf16 %v920_v7, %v920_v7 }
 0x19f   : > { %v537_v50 = vsel %vm536_vm8, %v533_v49, %v535_v48  ;;  %v538_v51 = vsel %vm536_vm8, %v535_v48, %v533_v49 }
 0x1a0   : > { %v552_v54 = vmul.f32 %v545_v41, %v538_v51  ;;  %v553_v55 = vmul.f32 %v549_v45, %v537_v50  ;;  %v930_v38 = vsel %vm307_vm0, %v924_v12, 0 }
 0x1a2   : > { %v556_v58 = vpack.c.bf16 %v552_v54, %v552_v54  ;;  %v557_v59 = vpack.c.bf16 %v553_v55, %v553_v55  ;;  %v979_v6 = vpop.permute.xlu1 %978 }
 0x1a3   : > { %v984_v10 = vsel %vm982_vm10, %v981_v8, %v979_v6  ;;  %v983_v17 = vsel %vm982_vm10, %v979_v6, %v981_v8 }
 0x1a4   : > { %1199 = vmatprep.subr.msk.bf16.mxu0 %vm307_vm0, %v557_v59  ;;  %1196 = vmatmul.mubr.msk.bf16.vlgmr.msra.gmra.mrb[4].mxu0 %vm431_vm5, %v402_v57  ;;  %v562_v62 = vsel %vm307_vm0, %v556_v58, 0  ;;  %v999_v13 = vmul.f32 %v995_v9, %v984_v10  ;;  %v998_v18 = vmul.f32 %v991_v15, %v983_v17 }
 0x1a5   : > { %568 = vmatpush1.bf16.msra.mxu0 %v562_v62  ;;  %599 = vmatprep.mubr.bf16.mxu0 %v1398_v0 }
 0x1a6   : > { %v1003_v16 = vpack.c.bf16 %v999_v13, %v999_v13  ;;  %v1002_v19 = vpack.c.bf16 %v998_v18, %v998_v18 }
 0x1a8   : > { %1211 = vmatmul.mubr.msk.bf16.vlgmr.msra.gmra.mrb[0].mxu1 %vm431_vm5, %v1209_v63  ;;  %v1008_v20 = vsel %vm307_vm0, %v1002_v19, 0 }
 0x1a9   : > { %858 = vmatpush1.bf16.msra.mxu1 %v852_v3  ;;  %889 = vmatprep.mubr.bf16.mxu1 %v1398_v0 }
 0x1aa   : > { %1218 = vmatprep.subr.msk.bf16.mxu1 %vm307_vm0, %v925_v2 }
 0x1ac   : > { %v1064_v31 = vpop.permute.xlu0 %1063 }
 0x1b0   : > { %1200 = vmatmul.mubr.msk.bf16.vlgmr.msra.gmra.mrb[4].mxu0 %vm431_vm5, %v1198_v11 }
 0x1b3   : > { %v1058_v26 = vpop.permute.xlu1 %1057 }
 0x1b4   : > { %1215 = vmatmul.mubr.msk.bf16.vlgmr.msra.gmra.mrb[0].mxu1 %vm431_vm5, %v1213_v14 }
 0x1b5   : > { %936 = vmatpush1.bf16.msra.mxu1 %v930_v38  ;;  %967 = vmatprep.mubr.bf16.mxu1 %v1398_v0 }
 0x1b6   : > { %1222 = vmatprep.subr.msk.bf16.mxu1 %vm307_vm0, %v1003_v16 }
 0x1c0   : > { %1219 = vmatmul.mubr.msk.bf16.vlgmr.msra.gmra.mrb[0].mxu1 %vm431_vm5, %v1217_v37 }
 0x1c1   : > { %1014 = vmatpush1.bf16.msra.mxu1 %v1008_v20  ;;  %1045 = vmatprep.mubr.bf16.mxu1 %v1398_v0  ;;  %v1068_v0 = vld [vmem:[%s269_s26] sm:$0xff] }
 0x1c2   : > { %v1070_v35 = vcombine.high %v1068_v0, %v1068_v0 }
 0x1cc   : > { %1223 = vmatmul.mubr.msk.bf16.vlgmr.msra.gmra.mrb[0].mxu1 %vm431_vm5, %v1221_v36 }
 0x283   : > { %v601_v21 = vpop.f32.mrb[4].mxu0 }
 0x284   : > { %v603_v22 = vpop.f32.mrb[5].mxu0 }
 0x285   : > { %v605_v23 = vpop.f32.mrb[6].mxu0 }
 0x286   : > { %v606_v24 = vpop.f32.mrb[7].mxu0 }
 0x29f   : > { %v1047_v25 = vpop.f32.mrb[0].mxu1 }
 0x2a0   : > { %v1231_v27 = vadd.f32 %v1047_v25, %v601_v21  ;;  %v1049_v28 = vpop.f32.mrb[1].mxu1 }
 0x2a1   : > { %v1232_v29 = vadd.f32 %v1049_v28, %v603_v22  ;;  %v1051_v30 = vpop.f32.mrb[2].mxu1 }
 0x2a2   : > { %v1060_v32 = vmul.f32 %v1231_v27, %v1058_v26  ;;  %v1052_v33 = vpop.f32.mrb[3].mxu1 }
 0x2a3   : > { %v1061_v34 = vmul.f32 %v1232_v29, %v1058_v26 }
 0x2a4   : > { %v1066_v39 = vadd.f32 %v1064_v31, %v1060_v32 }
 0x2a5   : > { %v1067_v40 = vadd.f32 %v1064_v31, %v1061_v34 }
 0x2a6   : > { %v1072_v41 = vadd.f32 %v1068_v0, %v1066_v39 }
 0x2a7   : > { %v1073_v42 = vadd.f32 %v1070_v35, %v1067_v40 }
 0x2a8   : > { %v1076_v43 = vmul.f32 0.70710677, %v1072_v41  ;;  %v1074_v47 = vmul.f32 0.5, %v1072_v41 }
 0x2a9   : > { %v1077_v44 = vmul.f32 0.70710677, %v1073_v42  ;;  %v1075_v49 = vmul.f32 0.5, %v1073_v42 }
 0x2aa   : > { %1330 = verf.f32 %v1076_v43 }
 0x2ab   : > { %1332 = verf.f32 %v1077_v44 }
 0x2b4   : > { %v1331_v45 = vpop.eup %1330 }
 0x2b5   : > { %v1333_v46 = vpop.eup %1332  ;;  %v1080_v48 = vadd.f32 1.0, %v1331_v45 }
 0x2b6   : > { %v1081_v50 = vadd.f32 1.0, %v1333_v46 }
 0x2b7   : > { %v1082_v51 = vmul.f32 %v1080_v48, %v1074_v47 }
 0x2b8   : > { %v1083_v52 = vmul.f32 %v1081_v50, %v1075_v49 }
 0x2ba   : > { %v1086_v53 = vcombine.low %v1082_v51, %v1083_v52 }
 0x2bc   : > { %1088 = vst [vmem:[%s259_s9] sm:$0xff] %v1086_v53 }
 0x2bd   : > { %1347 = shalt.err (!%p1344_p3)
}
 0x2be   : > { %s1348_s19 = scalar_lea.hbm %s1696_s14, 128  ;;  %s1352_s11 = scalar_lea.hbm %s1744_s6, 256 }
 0x2bf   : > { %p1349_p4 = scmp.ne.s32.totalorder %s1696_s14, %s1348_s19  ;;  %p1353_p9 = scmp.lt.u32.totalorder %s1696_s14, %s1744_s6 }
 0x2c0   : > { %p1354_p10 = scmp.lt.u32.totalorder %s1352_s11, %s1348_s19  ;;  %p1356_p12 = scmp.lt.u32.totalorder %s1348_s19, %s1696_s14 }
 0x2c1   : > { %p1350_p7 = pnand %p1349_p4, %p1484_p5 }
 0x2c2   : > { %p1355_p11 = por %p1354_p10, %p1353_p9 }
 0x2c3   : > { %p1351_p8 = pneg %p1350_p7 }
 0x2c4   : > { %p1357_p13 = por %p1356_p12, %p1355_p11 }
 0x2c6   : > { %p1358_p0 = pnand %p1357_p13, %p1351_p8 }
 0x2c8   : > { %1361 = shalt.err (!%p1358_p0)
}
 0x2c9   : > { %1262 = dma.vmem_to_hbm [thread:$0]  (%p1484_p5), %s1698_s10, 128, %s1696_s14, %s1090_s15  }
 0x2ca PF: > { %p1268_p1 = scmp.ge.s32.totalorder %s1396_s24, 2  ;;  %s1116_s9 = sand.u32 1, %s1384_s21  }
 0x2cb   : > { %s1117_s12 = scalar_lea.sflag [#allocation3], %s1116_s9 }
 0x2cc   : > { %p1265_p2 = pnand %p1268_p1, %p1488_p6 }
 0x2ce   : > { %1379 = dma.done.wait (!%p1265_p2), %s1117_s12, 128  }
 0x2cf   : > { %1381 = vsyncadd (!%p1265_p2), %s1117_s12, 4294967168  ;;  %p16_p3 = scmp.ge.s32.totalorder %s1471_s27, 4   ;;  %s1747_s21 = smov %s1388_s22 }
 0x2d0   : > { %s1748_s22 = smov %s1392_s23  ;;  %s1749_s23 = smov %s1482_s30 }
 0x2d1   : > { %s1750_s24 = smov %s1471_s27  ;;  %18 = sbr.rel (!%p16_p3) target bundleno = 3 (0x3), region = 97 }
 0x2d8   :  { %1122 = vsyncpa [#allocation3], 1 }
 0x2d9   :  { %1124 = vsyncpa [#allocation3 + $0x1], 1 }

</bundles_post_ra>
